<compile_context>
chip_gen: v5e
topology: v5e:2x2
jax: 0.10.0
libtpu: 0.0.40
codegen_flags: <defaults>
</compile_context>

<pallas_src>
import jax
import jax.numpy as jnp
from jax.experimental import pallas as pl
from jax.experimental.pallas import tpu as pltpu


def _mlp_kernel(x_ref, w1_ref, b1_ref, w2_ref, b2_ref, o_ref):
    # Two MXU matmuls with f32 accumulation; bias adds + ReLU on the VPU.
    h = jnp.dot(x_ref[...], w1_ref[...],
                preferred_element_type=jnp.float32)          # (TB, 128) f32
    h = jnp.maximum(h + b1_ref[...], 0.0)
    y = jnp.dot(h.astype(w2_ref.dtype), w2_ref[...],
                preferred_element_type=jnp.float32)          # (TB, 128) lane-dense
    o_ref[...] = (y + b2_ref[...]).astype(o_ref.dtype)


def nn_forward(x_nchw, w1, b1, w2, b2, *, tb=2048, use_bf16=False,
               return_padded=False):
    """Forward pass of NN.

    x_nchw: (B, 1, 28, 28).  w1: (784, 128), b1: (128,) or (1, 128),
    w2: (128, 10), b2: (10,) or (1, 10) — weights transposed relative to
    PyTorch's (out, in) storage.

    Returns (B, 10) f32 logits, or the lane-padded (B, 128) slab if
    `return_padded=True` (padded columns are exact zeros + bias columns of 0).
    """
    B = x_nchw.shape[0]
    in_dim, hid = w1.shape                      # (784, 128)
    _, out_dim = w2.shape                       # (128, 10)
    n_pad = 128                                 # lane-dense fc2 width (don't use 256)

    compute_dtype = jnp.bfloat16 if use_bf16 else jnp.float32

    # nn.Flatten on NCHW == row-major reshape.  Single cast in the wrapper.
    x = x_nchw.reshape(B, in_dim).astype(compute_dtype)
    w1c = w1.astype(compute_dtype)
    w2_p = (jnp.zeros((hid, n_pad), jnp.float32)
            .at[:, :out_dim].set(w2.astype(jnp.float32))
            .astype(compute_dtype))
    b1_p = b1.reshape(1, hid).astype(jnp.float32)
    b2_p = jnp.zeros((1, n_pad), jnp.float32).at[:, :out_dim].set(
        b2.reshape(1, out_dim).astype(jnp.float32))

    # ---- Batch tiling.  No jnp.pad: the ragged last block is handled by
    # Pallas (OOB input rows are never reduced over; OOB output writes masked).
    def _round8(v):
        return max(8, ((int(v) + 7) // 8) * 8)

    tb = max(8, (int(tb) // 8) * 8)             # multiple of 8 sublanes
    tb = min(tb, _round8(B))                    # don't exceed the batch
    if B >= 16:
        # Keep >= 2 grid steps so the parallel batch axis can shard across
        # both TensorCores on v7x.  Neutral/harmless on v5e/v6e.
        tb = min(tb, _round8(pl.cdiv(B, 2)))
    grid = (pl.cdiv(B, tb),)

    in_bytes = jnp.dtype(compute_dtype).itemsize
    cost = pl.CostEstimate(
        flops=2 * B * (in_dim * hid + hid * n_pad),
        transcendentals=0,
        bytes_accessed=(in_bytes * (B * in_dim + in_dim * hid + hid * n_pad)
                        + 4 * (hid + n_pad + B * n_pad)),
    )

    out_p = pl.pallas_call(
        _mlp_kernel,
        out_shape=jax.ShapeDtypeStruct((B, n_pad), jnp.float32),
        grid=grid,
        in_specs=[
            # Streamed activation tiles (double-buffered by the pipeline).
            pl.BlockSpec((tb, in_dim), lambda i: (i, 0)),
            # Weights / biases: constant index_map -> DMA'd once, resident.
            pl.BlockSpec((in_dim, hid), lambda i: (0, 0)),
            pl.BlockSpec((1, hid), lambda i: (0, 0)),
            pl.BlockSpec((hid, n_pad), lambda i: (0, 0)),
            pl.BlockSpec((1, n_pad), lambda i: (0, 0)),
        ],
        out_specs=pl.BlockSpec((tb, n_pad), lambda i: (i, 0)),
        compiler_params=pltpu.CompilerParams(
            dimension_semantics=("parallel",),
            # Explicit limit: v5e scoped default is only 16 MiB; tb=2048 f32
            # (~18 MiB) fits here and well inside v7x's 64 MiB physical VMEM.
            vmem_limit_bytes=32 * 1024 * 1024,
        ),
        cost_estimate=cost,
    )(x, w1c, b1_p, w2_p, b2_p)

    if return_padded:
        return out_p                      # (B, 128): consumer slices/fuses itself
    return out_p[:, :out_dim]             # (B, 10)


def _reference(x_nchw, w1, b1, w2, b2):
    x = x_nchw.reshape(x_nchw.shape[0], -1)
    h = jnp.maximum(x @ w1 + b1.reshape(1, -1), 0.0)
    return h @ w2 + b2.reshape(1, -1)


if __name__ == "__main__":
    key = jax.random.PRNGKey(0)
    k_x, k_w1, k_b1, k_w2, k_b2 = jax.random.split(key, 5)

    B, IN, HID, OUT = 8, 28 * 28, 128, 10

    # Deterministic synthetic parameters (PyTorch-style uniform fan-in init).
    bound1 = 1.0 / jnp.sqrt(IN)
    bound2 = 1.0 / jnp.sqrt(HID)
    w1 = jax.random.uniform(k_w1, (IN, HID), jnp.float32, -bound1, bound1)
    b1 = jax.random.uniform(k_b1, (HID,), jnp.float32, -bound1, bound1)
    w2 = jax.random.uniform(k_w2, (HID, OUT), jnp.float32, -bound2, bound2)
    b2 = jax.random.uniform(k_b2, (OUT,), jnp.float32, -bound2, bound2)

    # Input mimics MNIST digits: (B, 1, 28, 28) NCHW.
    x = jax.random.uniform(k_x, (B, 1, 28, 28), jnp.float32)

    ref = _reference(x, w1, b1, w2, b2)

    # f32 path: strict check against the reference.
    out = jax.block_until_ready(nn_forward(x, w1, b1, w2, b2))
    assert out.shape == (B, OUT)
    assert jnp.allclose(out, ref, atol=1e-4, rtol=1e-4)

    # bf16 fast path (halves HBM traffic; f32 accumulation): loose tolerance
    # because bf16 inputs carry ~0.4% relative quantization error.
    out_bf16 = jax.block_until_ready(nn_forward(x, w1, b1, w2, b2, use_bf16=True))
    assert out_bf16.shape == (B, OUT)
    assert jnp.allclose(out_bf16, ref, atol=1e-1, rtol=1e-1)

    print("KERNEL_OK")
</pallas_src>

<mosaic_0001>
module attributes {stable_mosaic.version = 11 : i64} {
  func.func @_mlp_kernel(%arg0: i32, %arg1: memref<8x784xf32, #tpu.memory_space<vmem>>, %arg2: memref<784x128xf32, #tpu.memory_space<vmem>>, %arg3: memref<1x128xf32, #tpu.memory_space<vmem>>, %arg4: memref<128x128xf32, #tpu.memory_space<vmem>>, %arg5: memref<1x128xf32, #tpu.memory_space<vmem>>, %arg6: memref<8x128xf32, #tpu.memory_space<vmem>>) attributes {dimension_semantics = [#tpu.dimension_semantics<parallel>], iteration_bounds = array<i64: 1>, scalar_prefetch = 0 : i64, scratch_operands = 0 : i64, tpu.core_type = #tpu.core_type<tc>, window_params = [{transform_indices = @transform_0, window_bounds = array<i64: 8, 784>}, {pipeline_mode = #tpu.pipeline_mode<synchronous>, transform_indices = @transform_1, window_bounds = array<i64: 784, 128>}, {pipeline_mode = #tpu.pipeline_mode<synchronous>, transform_indices = @transform_2, window_bounds = array<i64: 1, 128>}, {pipeline_mode = #tpu.pipeline_mode<synchronous>, transform_indices = @transform_3, window_bounds = array<i64: 128, 128>}, {pipeline_mode = #tpu.pipeline_mode<synchronous>, transform_indices = @transform_4, window_bounds = array<i64: 1, 128>}, {transform_indices = @transform_5, window_bounds = array<i64: 8, 128>}]} {
    %c0 = arith.constant 0 : index
    %c0_0 = arith.constant 0 : index
    %0 = vector.load %arg1[%c0, %c0_0] : memref<8x784xf32, #tpu.memory_space<vmem>>, vector<8x784xf32>
    %c0_1 = arith.constant 0 : index
    %c0_2 = arith.constant 0 : index
    %1 = vector.load %arg2[%c0_1, %c0_2] : memref<784x128xf32, #tpu.memory_space<vmem>>, vector<784x128xf32>
    %cst = arith.constant dense<0.000000e+00> : vector<8x128xf32>
    %2 = tpu.matmul %0, %1, %cst {dimension_numbers = #tpu.dot_dimension_numbers<[1], [0], [0], [1], [0, 0, 1, 1], [], []>} : vector<8x784xf32>, vector<784x128xf32>, vector<8x128xf32> -> vector<8x128xf32>
    %c0_3 = arith.constant 0 : index
    %c0_4 = arith.constant 0 : index
    %3 = vector.load %arg3[%c0_3, %c0_4] : memref<1x128xf32, #tpu.memory_space<vmem>>, vector<1x128xf32>
    %4 = vector.broadcast %3 : vector<1x128xf32> to vector<8x128xf32>
    %5 = arith.addf %2, %4 : vector<8x128xf32>
    %cst_5 = arith.constant 0.000000e+00 : f32
    %6 = vector.broadcast %cst_5 : f32 to vector<8x128xf32>
    %7 = arith.maximumf %5, %6 : vector<8x128xf32>
    %c0_6 = arith.constant 0 : index
    %c0_7 = arith.constant 0 : index
    %8 = vector.load %arg4[%c0_6, %c0_7] : memref<128x128xf32, #tpu.memory_space<vmem>>, vector<128x128xf32>
    %cst_8 = arith.constant dense<0.000000e+00> : vector<8x128xf32>
    %9 = tpu.matmul %7, %8, %cst_8 {dimension_numbers = #tpu.dot_dimension_numbers<[1], [0], [0], [1], [0, 0, 1, 1], [], []>} : vector<8x128xf32>, vector<128x128xf32>, vector<8x128xf32> -> vector<8x128xf32>
    %c0_9 = arith.constant 0 : index
    %c0_10 = arith.constant 0 : index
    %10 = vector.load %arg5[%c0_9, %c0_10] : memref<1x128xf32, #tpu.memory_space<vmem>>, vector<1x128xf32>
    %11 = vector.broadcast %10 : vector<1x128xf32> to vector<8x128xf32>
    %12 = arith.addf %9, %11 : vector<8x128xf32>
    %c0_11 = arith.constant 0 : index
    %c0_12 = arith.constant 0 : index
    %13 = vector.load %arg6[%c0_11, %c0_12] : memref<8x128xf32, #tpu.memory_space<vmem>>, vector<8x128xf32>
    tpu.vector_store %arg6[%c0_11, %c0_12], %12 {strides = array<i32>} : memref<8x128xf32, #tpu.memory_space<vmem>>, vector<8x128xf32>,
    return
  }
  func.func @transform_0(%arg0: i32) -> (i32, i32) {
    %c0_i32 = arith.constant 0 : i32
    %c0_i32_0 = arith.constant 0 : i32
    return %arg0, %c0_i32 : i32, i32
  }
  func.func @transform_1(%arg0: i32) -> (i32, i32) {
    %c0_i32 = arith.constant 0 : i32
    %c0_i32_0 = arith.constant 0 : i32
    %c0_i32_1 = arith.constant 0 : i32
    return %c0_i32, %c0_i32_0 : i32, i32
  }
  func.func @transform_2(%arg0: i32) -> (i32, i32) {
    %c0_i32 = arith.constant 0 : i32
    %c0_i32_0 = arith.constant 0 : i32
    %c0_i32_1 = arith.constant 0 : i32
    return %c0_i32, %c0_i32_0 : i32, i32
  }
  func.func @transform_3(%arg0: i32) -> (i32, i32) {
    %c0_i32 = arith.constant 0 : i32
    %c0_i32_0 = arith.constant 0 : i32
    %c0_i32_1 = arith.constant 0 : i32
    return %c0_i32, %c0_i32_0 : i32, i32
  }
  func.func @transform_4(%arg0: i32) -> (i32, i32) {
    %c0_i32 = arith.constant 0 : i32
    %c0_i32_0 = arith.constant 0 : i32
    %c0_i32_1 = arith.constant 0 : i32
    return %c0_i32, %c0_i32_0 : i32, i32
  }
  func.func @transform_5(%arg0: i32) -> (i32, i32) {
    %c0_i32 = arith.constant 0 : i32
    %c0_i32_0 = arith.constant 0 : i32
    return %arg0, %c0_i32 : i32, i32
  }
}

</mosaic_0001>

<bundles_post_ra>
// kernel: tpu_custom_call.1
= control target key start
LH: loop header
LB: loop body
LE: loop exit
PB: predicated region body
PF: predicated region fallthrough
CT: control target
= control target key end

     0   :  { %10 = vsyncpa [#allocation3], 0  ;;  %s544_s0 = inlined_call_operand.hbm [shape: f32[8,784], index: 0, kind: input, shape index: {}]   ;;  %s545_s1 = inlined_call_operand.hbm [shape: f32[784,128], index: 1, kind: input, shape index: {}]   ;;  %s546_s2 = inlined_call_operand.vmem [shape: f32[1,128], index: 2, kind: input, shape index: {}]   ;;  %s547_s3 = inlined_call_operand.hbm [shape: f32[128,128], index: 3, kind: input, shape index: {}]   ;;  %s548_s4 = inlined_call_operand.vmem [shape: f32[1,128], index: 4, kind: input, shape index: {}]   ;;  %s549_s5 = inlined_call_operand.hbm [shape: f32[8,128], index: 5, kind: output, shape index: {}]  }
   0x1   :  { %11 = vsyncpa [#allocation6], 0  ;;  %s28_s20 = sshll.u32 %s545_s1, 4  ;;  %s29_s20 = int_to_ptr.hbm [resolvable:$true] %s28_s20 }
   0x2   :  { %12 = vsyncpa [#allocation4], 0  ;;  %s490_s21 = smov [#allocation5]   ;;  %s18_s25 = sshll.u32 %s544_s0, 4  ;;  %s19_s25 = int_to_ptr.hbm [resolvable:$true] %s18_s25 }
   0x3   :  { %s30_s22 = sshll.u32 %s490_s21, 4  ;;  %s491_s26 = smov 128   ;;  %s31_s22 = int_to_ptr.vmem [resolvable:$true] %s30_s22 }
   0x4   :  { %s492_s27 = smov 8   ;;  %s493_s28 = smov [#allocation2]  }
   0x5   :  { %36 = dma.hbm_to_vmem [thread:$0]  %s29_s20, 12544, %s31_s22, [#allocation6], %s491_s26, %s491_s26, %s492_s27  }
   0x6   :  { %s20_s29 = sshll.u32 %s493_s28, 4  ;;  %s43_s7 = sshll.u32 %s547_s3, 4  ;;  %s21_s29 = int_to_ptr.vmem [resolvable:$true] %s20_s29  ;;  %s44_s7 = int_to_ptr.hbm [resolvable:$true] %s43_s7 }
   0x7   :  { %23 = dma.hbm_to_vmem [thread:$0]  %s19_s25, 896, %s21_s29, [#allocation3]  }
   0x8   :  { %s494_s1 = smov [#allocation7]  }
   0x9   :  { %s45_s8 = sshll.u32 %s494_s1, 4  ;;  %s46_s8 = int_to_ptr.vmem [resolvable:$true] %s45_s8 }
   0xa   :  { %51 = dma.hbm_to_vmem [thread:$0]  %s44_s7, 2048, %s46_s8, [#allocation6], %s491_s26, %s491_s26, %s492_s27  }
   0xb   :  { %484 = dma.done.wait [#allocation3], 896  }
   0xc   :  { %485 = vsyncadd [#allocation3], 4294966400 }
   0xd   :  { %486 = dma.done.wait [#allocation6], 14592  }
   0xe   :  { %487 = vsyncadd [#allocation6], 4294952704  ;;  %v88_v0 = vld [vmem:[#allocation5 + $0x78] sm:$0xff]  ;;  %v87_v1 = vld [vmem:[#allocation5 + $0x70] sm:$0xff]  ;;  %vm175_vm0 = vcmask 130048   ;;  %s368_s14 = sshll.u32 %s549_s5, 4  ;;  %s369_s14 = int_to_ptr.hbm [resolvable:$true] %s368_s14 }
   0xf   :  { %v104_v2 = vld [vmem:[#allocation5 + $0xf8] sm:$0xff]  ;;  %179 = vmatpush.msra.mxu0 %v88_v0  ;;  %v103_v3 = vld [vmem:[#allocation5 + $0xf0] sm:$0xff]  ;;  %v86_v4 = vld [vmem:[#allocation5 + $0x68] sm:$0xff] }
  0x10   :  { %199 = vmatpush.msra.mxu1 %v104_v2  ;;  %v102_v5 = vld [vmem:[#allocation5 + $0xe8] sm:$0xff]  ;;  %v85_v6 = vld [vmem:[#allocation5 + $0x60] sm:$0xff]  ;;  %v84_v8 = vld [vmem:[#allocation5 + $0x58] sm:$0xff] }
  0x11   :  { %180 = vmatpush.msra.mxu0 %v87_v1  ;;  %v101_v7 = vld [vmem:[#allocation5 + $0xe0] sm:$0xff]  ;;  %v100_v9 = vld [vmem:[#allocation5 + $0xd8] sm:$0xff]  ;;  %v83_v10 = vld [vmem:[#allocation5 + $0x50] sm:$0xff] }
  0x12   :  { %200 = vmatpush.msra.mxu1 %v103_v3  ;;  %v120_v11 = vld [vmem:[#allocation5 + $0x178] sm:$0xff]  ;;  %v99_v12 = vld [vmem:[#allocation5 + $0xd0] sm:$0xff]  ;;  %v118_v15 = vld [vmem:[#allocation5 + $0x168] sm:$0xff] }
  0x13   :  { %181 = vmatpush.msra.mxu0 %v86_v4  ;;  %219 = vmatpush.msra.mxu2 %v120_v11  ;;  %v119_v13 = vld [vmem:[#allocation5 + $0x170] sm:$0xff]  ;;  %v136_v14 = vld [vmem:[#allocation5 + $0x1f8] sm:$0xff]  ;;  %v82_v17 = vld [vmem:[#allocation5 + $0x48] sm:$0xff] }
  0x14   :  { %201 = vmatpush.msra.mxu1 %v102_v5  ;;  %v135_v16 = vld [vmem:[#allocation5 + $0x1f0] sm:$0xff]  ;;  %v98_v18 = vld [vmem:[#allocation5 + $0xc8] sm:$0xff]  ;;  %239 = vmatpush.msra.mxu3 %v136_v14  ;;  %v117_v19 = vld [vmem:[#allocation5 + $0x160] sm:$0xff] }
  0x15   :  { %182 = vmatpush.msra.mxu0 %v85_v6  ;;  %220 = vmatpush.msra.mxu2 %v119_v13  ;;  %v134_v20 = vld [vmem:[#allocation5 + $0x1e8] sm:$0xff]  ;;  %v81_v21 = vld [vmem:[#allocation5 + $0x40] sm:$0xff]  ;;  %v116_v23 = vld [vmem:[#allocation5 + $0x158] sm:$0xff] }
  0x16   :  { %202 = vmatpush.msra.mxu1 %v101_v7  ;;  %v97_v22 = vld [vmem:[#allocation5 + $0xc0] sm:$0xff]  ;;  %240 = vmatpush.msra.mxu3 %v135_v16  ;;  %v80_v25 = vld [vmem:[#allocation5 + $0x38] sm:$0xff]  ;;  %v115_v27 = vld [vmem:[#allocation5 + $0x150] sm:$0xff] }
  0x17   :  { %183 = vmatpush.msra.mxu0 %v84_v8  ;;  %221 = vmatpush.msra.mxu2 %v118_v15  ;;  %v133_v24 = vld [vmem:[#allocation5 + $0x1e0] sm:$0xff]  ;;  %v96_v26 = vld [vmem:[#allocation5 + $0xb8] sm:$0xff]  ;;  %v79_v29 = vld [vmem:[#allocation5 + $0x30] sm:$0xff] }
  0x18   :  { %203 = vmatpush.msra.mxu1 %v100_v9  ;;  %241 = vmatpush.msra.mxu3 %v134_v20  ;;  %v132_v28 = vld [vmem:[#allocation5 + $0x1d8] sm:$0xff]  ;;  %v95_v30 = vld [vmem:[#allocation5 + $0xb0] sm:$0xff]  ;;  %v114_v31 = vld [vmem:[#allocation5 + $0x148] sm:$0xff] }
  0x19   :  { %184 = vmatpush.msra.mxu0 %v83_v10  ;;  %222 = vmatpush.msra.mxu2 %v117_v19  ;;  %v131_v32 = vld [vmem:[#allocation5 + $0x1d0] sm:$0xff]  ;;  %v78_v33 = vld [vmem:[#allocation5 + $0x28] sm:$0xff]  ;;  %v113_v35 = vld [vmem:[#allocation5 + $0x140] sm:$0xff] }
  0x1a   :  { %204 = vmatpush.msra.mxu1 %v99_v12  ;;  %242 = vmatpush.msra.mxu3 %v133_v24  ;;  %v94_v34 = vld [vmem:[#allocation5 + $0xa8] sm:$0xff]  ;;  %v77_v37 = vld [vmem:[#allocation5 + $0x20] sm:$0xff]  ;;  %v112_v39 = vld [vmem:[#allocation5 + $0x138] sm:$0xff] }
  0x1b   :  { %185 = vmatpush.msra.mxu0 %v82_v17  ;;  %223 = vmatpush.msra.mxu2 %v116_v23  ;;  %v130_v36 = vld [vmem:[#allocation5 + $0x1c8] sm:$0xff]  ;;  %v93_v38 = vld [vmem:[#allocation5 + $0xa0] sm:$0xff]  ;;  %v76_v41 = vld [vmem:[#allocation5 + $0x18] sm:$0xff] }
  0x1c   :  { %205 = vmatpush.msra.mxu1 %v98_v18  ;;  %243 = vmatpush.msra.mxu3 %v132_v28  ;;  %v129_v40 = vld [vmem:[#allocation5 + $0x1c0] sm:$0xff]  ;;  %v92_v42 = vld [vmem:[#allocation5 + $0x98] sm:$0xff]  ;;  %v111_v43 = vld [vmem:[#allocation5 + $0x130] sm:$0xff] }
  0x1d   :  { %186 = vmatpush.msra.mxu0 %v81_v21  ;;  %224 = vmatpush.msra.mxu2 %v115_v27  ;;  %v128_v44 = vld [vmem:[#allocation5 + $0x1b8] sm:$0xff]  ;;  %v75_v45 = vld [vmem:[#allocation5 + $0x10] sm:$0xff]  ;;  %v110_v47 = vld [vmem:[#allocation5 + $0x128] sm:$0xff] }
  0x1e   :  { %206 = vmatpush.msra.mxu1 %v97_v22  ;;  %244 = vmatpush.msra.mxu3 %v131_v32  ;;  %v91_v46 = vld [vmem:[#allocation5 + $0x90] sm:$0xff]  ;;  %v74_v49 = vld [vmem:[#allocation5 + $0x8] sm:$0xff]  ;;  %v109_v51 = vld [vmem:[#allocation5 + $0x120] sm:$0xff] }
  0x1f   :  { %187 = vmatpush.msra.mxu0 %v80_v25  ;;  %225 = vmatpush.msra.mxu2 %v114_v31  ;;  %v127_v48 = vld [vmem:[#allocation5 + $0x1b0] sm:$0xff]  ;;  %v90_v50 = vld [vmem:[#allocation5 + $0x88] sm:$0xff]  ;;  %v73_v53 = vld [vmem:[#allocation5] sm:$0xff] }
  0x20   :  { %207 = vmatpush.msra.mxu1 %v96_v26  ;;  %245 = vmatpush.msra.mxu3 %v130_v36  ;;  %v126_v52 = vld [vmem:[#allocation5 + $0x1a8] sm:$0xff]  ;;  %v89_v54 = vld [vmem:[#allocation5 + $0x80] sm:$0xff]  ;;  %v152_v55 = vld [vmem:[#allocation5 + $0x278] sm:$0xff] }
  0x21   :  { %188 = vmatpush.msra.mxu0 %v79_v29  ;;  %226 = vmatpush.msra.mxu2 %v113_v35  ;;  %v168_v56 = vld [vmem:[#allocation5 + $0x2f8] sm:$0xff]  ;;  %v125_v58 = vld [vmem:[#allocation5 + $0x1a0] sm:$0xff]  ;;  %v151_v59 = vld [vmem:[#allocation5 + $0x270] sm:$0xff] }
  0x22   :  { %208 = vmatpush.msra.mxu1 %v95_v30  ;;  %246 = vmatpush.msra.mxu3 %v129_v40  ;;  %v108_v57 = vld [vmem:[#allocation5 + $0x118] sm:$0xff]  ;;  %v167_v60 = vld [vmem:[#allocation5 + $0x2f0] sm:$0xff]  ;;  %v150_v63 = vld [vmem:[#allocation5 + $0x268] sm:$0xff] }
  0x23   :  { %189 = vmatpush.msra.mxu0 %v78_v33  ;;  %227 = vmatpush.msra.mxu2 %v112_v39  ;;  %v107_v61 = vld [vmem:[#allocation5 + $0x110] sm:$0xff]  ;;  %v124_v62 = vld [vmem:[#allocation5 + $0x198] sm:$0xff]  ;;  %v166_v0 = vld [vmem:[#allocation5 + $0x2e8] sm:$0xff] }
  0x24   :  { %209 = vmatpush.msra.mxu1 %v94_v34  ;;  %247 = vmatpush.msra.mxu3 %v128_v44  ;;  %v106_v1 = vld [vmem:[#allocation5 + $0x108] sm:$0xff]  ;;  %v123_v2 = vld [vmem:[#allocation5 + $0x190] sm:$0xff]  ;;  %v149_v3 = vld [vmem:[#allocation5 + $0x260] sm:$0xff] }
  0x25   :  { %190 = vmatpush.msra.mxu0 %v77_v37  ;;  %228 = vmatpush.msra.mxu2 %v111_v43  ;;  %v165_v4 = vld [vmem:[#allocation5 + $0x2e0] sm:$0xff]  ;;  %v122_v6 = vld [vmem:[#allocation5 + $0x188] sm:$0xff]  ;;  %v148_v7 = vld [vmem:[#allocation5 + $0x258] sm:$0xff] }
  0x26   :  { %210 = vmatpush.msra.mxu1 %v93_v38  ;;  %248 = vmatpush.msra.mxu3 %v127_v48  ;;  %v105_v5 = vld [vmem:[#allocation5 + $0x100] sm:$0xff]  ;;  %v164_v8 = vld [vmem:[#allocation5 + $0x2d8] sm:$0xff]  ;;  %v147_v11 = vld [vmem:[#allocation5 + $0x250] sm:$0xff] }
  0x27   :  { %191 = vmatpush.msra.mxu0 %v76_v41  ;;  %229 = vmatpush.msra.mxu2 %v110_v47  ;;  %v68_v9 = vld [vmem:[#allocation2 + $0x10] sm:$0xff]  ;;  %v121_v10 = vld [vmem:[#allocation5 + $0x180] sm:$0xff]  ;;  %v163_v12 = vld [vmem:[#allocation5 + $0x2d0] sm:$0xff] }
  0x28   :  { %211 = vmatpush.msra.mxu1 %v92_v42  ;;  %249 = vmatpush.msra.mxu3 %v126_v52  ;;  %v170_v13 = vld [vmem:[#allocation5 + $0x308] sm:$0xff]  ;;  %v69_v17 = vld [vmem:[#allocation2 + $0x18] sm:$0xff]  ;;  %v67_v18 = vld [vmem:[#allocation2 + $0x8] sm:$0xff] }
  0x29   :  { %192 = vmatpush.msra.mxu0 %v75_v45  ;;  %230 = vmatpush.msra.mxu2 %v109_v51  ;;  %v66_v14 = vld [vmem:[#allocation2] sm:$0xff]  ;;  %v145_v19 = vld [vmem:[#allocation5 + $0x240] sm:$0xff]  ;;  %v144_v23 = vld [vmem:[#allocation5 + $0x238] sm:$0xff] }
  0x2a   :  { %212 = vmatpush.msra.mxu1 %v91_v46  ;;  %250 = vmatpush.msra.mxu3 %v125_v58  ;;  %v146_v15 = vld [vmem:[#allocation5 + $0x248] sm:$0xff]  ;;  %v161_v20 = vld [vmem:[#allocation5 + $0x2c0] sm:$0xff]  ;;  %v160_v24 = vld [vmem:[#allocation5 + $0x2b8] sm:$0xff] }
  0x2b   :  { %193 = vmatpush.msra.mxu0 %v74_v49  ;;  %231 = vmatpush.msra.mxu2 %v108_v57  ;;  %v162_v16 = vld [vmem:[#allocation5 + $0x2c8] sm:$0xff]  ;;  %v169_v21 = vld [vmem:[#allocation5 + $0x300] sm:$0xff]  ;;  %v72_v25 = vld [vmem:[#allocation2 + $0x30] sm:$0xff] }
  0x2c   :  { %213 = vmatpush.msra.mxu1 %v90_v50  ;;  %251 = vmatpush.msra.mxu3 %v124_v62  ;;  %v335_v22 = vld [vmem:[#allocation7 + $0x78] sm:$0xff]  ;;  %v334_v26 = vld [vmem:[#allocation7 + $0x70] sm:$0xff]  ;;  %v143_v27 = vld [vmem:[#allocation5 + $0x230] sm:$0xff] }
  0x2d   :  { %194 = vmatpush.msra.mxu0 %v73_v53  ;;  %232 = vmatpush.msra.mxu2 %v107_v61  ;;  %v159_v28 = vld [vmem:[#allocation5 + $0x2b0] sm:$0xff]  ;;  %v333_v29 = vld [vmem:[#allocation7 + $0x68] sm:$0xff]  ;;  %v142_v30 = vld [vmem:[#allocation5 + $0x228] sm:$0xff] }
  0x2e   :  { %214 = vmatpush.msra.mxu1 %v89_v54  ;;  %252 = vmatpush.msra.mxu3 %v123_v2  ;;  %v158_v31 = vld [vmem:[#allocation5 + $0x2a8] sm:$0xff]  ;;  %v332_v32 = vld [vmem:[#allocation7 + $0x60] sm:$0xff]  ;;  %v141_v33 = vld [vmem:[#allocation5 + $0x220] sm:$0xff] }
  0x2f   :  { %259 = vmatpush.msrb.mxu0 %v152_v55  ;;  %233 = vmatpush.msra.mxu2 %v106_v1  ;;  %v157_v34 = vld [vmem:[#allocation5 + $0x2a0] sm:$0xff]  ;;  %v331_v35 = vld [vmem:[#allocation7 + $0x58] sm:$0xff]  ;;  %v140_v36 = vld [vmem:[#allocation5 + $0x218] sm:$0xff] }
  0x30   :  { %279 = vmatpush.msrb.mxu1 %v168_v56  ;;  %253 = vmatpush.msra.mxu3 %v122_v6  ;;  %v156_v37 = vld [vmem:[#allocation5 + $0x298] sm:$0xff]  ;;  %v330_v38 = vld [vmem:[#allocation7 + $0x50] sm:$0xff]  ;;  %v139_v39 = vld [vmem:[#allocation5 + $0x210] sm:$0xff] }
  0x31   :  { %260 = vmatpush.msrb.mxu0 %v151_v59  ;;  %234 = vmatpush.msra.mxu2 %v105_v5  ;;  %v155_v40 = vld [vmem:[#allocation5 + $0x290] sm:$0xff]  ;;  %v329_v41 = vld [vmem:[#allocation7 + $0x48] sm:$0xff]  ;;  %v138_v42 = vld [vmem:[#allocation5 + $0x208] sm:$0xff] }
  0x32   :  { %280 = vmatpush.msrb.mxu1 %v167_v60  ;;  %235 = vmatmul.f32.vlgmr.msra.gmra.mxu2 %v68_v9  ;;  %v154_v43 = vld [vmem:[#allocation5 + $0x288] sm:$0xff]  ;;  %v137_v44 = vld [vmem:[#allocation5 + $0x200] sm:$0xff]  ;;  %v71_v47 = vld [vmem:[#allocation2 + $0x28] sm:$0xff] }
  0x33   :  { %261 = vmatpush.msrb.mxu0 %v150_v63  ;;  %254 = vmatpush.msra.mxu3 %v121_v10  ;;  %v153_v45 = vld [vmem:[#allocation5 + $0x280] sm:$0xff]  ;;  %v70_v46 = vld [vmem:[#allocation2 + $0x20] sm:$0xff]  ;;  %v328_v48 = vld [vmem:[#allocation7 + $0x40] sm:$0xff] }
  0x34   :  { %281 = vmatpush.msrb.mxu1 %v166_v0  ;;  %313 = vmatpush.msrb.mxu2 %v170_v13  ;;  %v327_v49 = vld [vmem:[#allocation7 + $0x38] sm:$0xff]  ;;  %v326_v50 = vld [vmem:[#allocation7 + $0x30] sm:$0xff]  ;;  %v325_v51 = vld [vmem:[#allocation7 + $0x28] sm:$0xff] }
  0x35   :  { %262 = vmatpush.msrb.mxu0 %v149_v3  ;;  %255 = vmatmul.f32.vlgmr.msra.gmra.mxu3 %v69_v17  ;;  %v324_v52 = vld [vmem:[#allocation7 + $0x20] sm:$0xff]  ;;  %v323_v53 = vld [vmem:[#allocation7 + $0x18] sm:$0xff]  ;;  %v322_v54 = vld [vmem:[#allocation7 + $0x10] sm:$0xff] }
  0x36   :  { %282 = vmatpush.msrb.mxu1 %v165_v4  ;;  %195 = vmatmul.f32.vlgmr.msra.gmra.mxu0 %v66_v14  ;;  %v321_v55 = vld [vmem:[#allocation7 + $0x8] sm:$0xff]  ;;  %v320_v56 = vld [vmem:[#allocation7] sm:$0xff]  ;;  %v386_v57 = vld [vmem:[%s546_s2] ss:$0 sm:$0xff]  ;;  %s495_s2 = smov [#allocation8]  }
  0x37   :  { %263 = vmatpush.msrb.mxu0 %v148_v7  ;;  %215 = vmatmul.f32.vlgmr.msra.gmra.mxu1 %v67_v18  ;;  %v387_v9 = vld [vmem:[%s548_s4] ss:$0 sm:$0xff]  ;;  %s366_s11 = sshll.u32 %s495_s2, 4  ;;  %s367_s11 = int_to_ptr.vmem [resolvable:$true] %s366_s11 }
  0x38   :  { %283 = vmatpush.msrb.mxu1 %v164_v8  ;;  %314 = vmatpush.msrb.mxu2 %v169_v21 }
  0x39   :  { %264 = vmatpush.msrb.mxu0 %v147_v11  ;;  %340 = vmatpush.msrb.mxu3 %v335_v22 }
  0x3a   :  { %284 = vmatpush.msrb.mxu1 %v163_v12  ;;  %379 = vmatmul.msk.f32.vlgmr.msrb.gmra.mxu2 %vm175_vm0, %v72_v25 }
  0x3b   :  { %265 = vmatpush.msrb.mxu0 %v146_v15  ;;  %341 = vmatpush.msrb.mxu3 %v334_v26 }
  0x3c   :  { %285 = vmatpush.msrb.mxu1 %v162_v16 }
  0x3d   :  { %266 = vmatpush.msrb.mxu0 %v145_v19  ;;  %342 = vmatpush.msrb.mxu3 %v333_v29 }
  0x3e   :  { %286 = vmatpush.msrb.mxu1 %v161_v20 }
  0x3f   :  { %267 = vmatpush.msrb.mxu0 %v144_v23  ;;  %343 = vmatpush.msrb.mxu3 %v332_v32 }
  0x40   :  { %287 = vmatpush.msrb.mxu1 %v160_v24 }
  0x41   :  { %268 = vmatpush.msrb.mxu0 %v143_v27  ;;  %344 = vmatpush.msrb.mxu3 %v331_v35 }
  0x42   :  { %288 = vmatpush.msrb.mxu1 %v159_v28 }
  0x43   :  { %269 = vmatpush.msrb.mxu0 %v142_v30  ;;  %345 = vmatpush.msrb.mxu3 %v330_v38 }
  0x44   :  { %289 = vmatpush.msrb.mxu1 %v158_v31 }
  0x45   :  { %270 = vmatpush.msrb.mxu0 %v141_v33  ;;  %346 = vmatpush.msrb.mxu3 %v329_v41 }
  0x46   :  { %290 = vmatpush.msrb.mxu1 %v157_v34 }
  0x47   :  { %271 = vmatpush.msrb.mxu0 %v140_v36  ;;  %347 = vmatpush.msrb.mxu3 %v328_v48 }
  0x48   :  { %291 = vmatpush.msrb.mxu1 %v156_v37 }
  0x49   :  { %272 = vmatpush.msrb.mxu0 %v139_v39  ;;  %348 = vmatpush.msrb.mxu3 %v327_v49 }
  0x4a   :  { %292 = vmatpush.msrb.mxu1 %v155_v40 }
  0x4b   :  { %273 = vmatpush.msrb.mxu0 %v138_v42  ;;  %349 = vmatpush.msrb.mxu3 %v326_v50 }
  0x4c   :  { %293 = vmatpush.msrb.mxu1 %v154_v43 }
  0x4d   :  { %274 = vmatpush.msrb.mxu0 %v137_v44  ;;  %350 = vmatpush.msrb.mxu3 %v325_v51 }
  0x4e   :  { %294 = vmatpush.msrb.mxu1 %v153_v45  ;;  %275 = vmatmul.f32.vlgmr.msrb.gmra.mxu0 %v70_v46 }
  0x4f   :  { %295 = vmatmul.f32.vlgmr.msrb.gmra.mxu1 %v71_v47  ;;  %351 = vmatpush.msrb.mxu3 %v324_v52 }
  0x51   :  { %352 = vmatpush.msrb.mxu3 %v323_v53 }
  0x53   :  { %353 = vmatpush.msrb.mxu3 %v322_v54 }
  0x55   :  { %354 = vmatpush.msrb.mxu3 %v321_v55 }
  0x57   :  { %355 = vmatpush.msrb.mxu3 %v320_v56 }
  0xb3   :  { %v196_v58 = vpop.f32.mrf.mxu0 }
  0xb4   :  { %v197_v59 = vadd.f32 %v386_v57, %v196_v58  ;;  %v216_v60 = vpop.f32.mrf.mxu1 }
  0xb5   :  { %v236_v62 = vpop.f32.mrf.mxu2 }
  0xb6   :  { %v217_v61 = vadd.f32 %v216_v60, %v197_v59 }
  0xb8   :  { %v237_v63 = vadd.f32 %v236_v62, %v217_v61  ;;  %v256_v0 = vpop.f32.mrf.mxu3 }
  0xba   :  { %v257_v1 = vadd.f32 %v256_v0, %v237_v63 }
  0xbd   :  { %v316_v5 = vpop.f32.mrf.mxu2 }
  0xcb   :  { %v276_v2 = vpop.f32.mrf.mxu0 }
  0xcc   :  { %v296_v3 = vpop.f32.mrf.mxu1  ;;  %v277_v4 = vadd.f32 %v276_v2, %v257_v1 }
  0xce   :  { %v297_v6 = vadd.f32 %v296_v3, %v277_v4 }
  0xd0   :  { %v317_v7 = vadd.f32 %v316_v5, %v297_v6 }
  0xd2   :  { %v319_v8 = vmax.f32 %v317_v7, 0.0 }
  0xd4   :  { %356 = vmatmul.f32.vlgmr.msrb.gmra.mxu3 %v319_v8 }
 0x157   :  { %v357_v10 = vpop.f32.mrf.mxu3 }
 0x158   :  { %v358_v11 = vadd.f32 %v387_v9, %v357_v10 }
 0x15a   :  { %360 = vst [vmem:[#allocation8] sm:$0xff] %v358_v11 }
 0x15b   :  { %371 = dma.vmem_to_hbm [thread:$0]  %s367_s11, 128, %s369_s14, [#allocation4]  }
 0x15c   :  { %488 = dma.done.wait [#allocation4], 128  }
 0x15d   :  { %489 = vsyncadd [#allocation4], 4294967168 }
 0x15e   :  { %376 = vsyncpa [#allocation3], 1 }
 0x15f   :  { %377 = vsyncpa [#allocation6], 1 }
 0x160   :  { %378 = vsyncpa [#allocation4], 1 }

</bundles_post_ra>
